<compile_context>
chip_gen: v6e
topology: v6e:2x2x1
jax: 0.10.0
libtpu: 0.0.40
codegen_flags: <defaults>
</compile_context>

<pallas_src>
import jax
import jax.numpy as jnp
from jax.experimental import pallas as pl
from jax.experimental.pallas import tpu as pltpu

HIDDEN = 128
NEG_BIG = -1e30  # bias for padded action columns -> exp underflows to exactly 0


def _round_up(x, m):
    return ((x + m - 1) // m) * m


def policy_kernel(x_ref, w1_ref, b1_ref, w2_ref, b2_ref, out_ref):
    # x:  (T, obs_dim)            streamed over the batch grid
    # w1: (obs_dim, 128), b1: (1, 128)            VMEM-resident
    # w2: (128, ACT_PAD) zero-padded, b2: (1, ACT_PAD) with NEG_BIG in pad cols
    # out:(T, ACT_PAD)
    x = x_ref[...]

    # Linear 1 + ReLU   (MXU: (T, obs_dim) @ (obs_dim, 128); K=4 is fine,
    # the MXU is nowhere near the binding unit for this kernel).
    h = jnp.dot(x, w1_ref[...], preferred_element_type=jnp.float32) + b1_ref[...]
    h = jnp.maximum(h, 0.0)

    # Linear 2   (MXU: (T, 128) @ (128, ACT_PAD))
    logits = jnp.dot(h, w2_ref[...], preferred_element_type=jnp.float32) + b2_ref[...]

    # Numerically-stable softmax over the (narrow) last dim.  Padded columns
    # carry logits ~ -1e30: the max is taken over real logits, their exp is
    # exactly 0, so they contribute nothing to the denominator.
    m = jnp.max(logits, axis=-1, keepdims=True)
    e = jnp.exp(logits - m)
    denom = jnp.sum(e, axis=-1, keepdims=True)
    # approx=False is the *precise* reciprocal (divide/refinement), not the
    # cheap EUP path; it keeps results bit-close to e/denom for the 1e-5
    # tolerance check.  Perf-wise it is irrelevant (1 reciprocal vs. 8 exps
    # per row).
    out_ref[...] = (e * pl.reciprocal(denom, approx=False)).astype(out_ref.dtype)


def pad_action_head(w2, b2):
    """One-time (init-time) padding of the action head to a lane-friendly
    width.  Returns (w2p, b2p) with ACT_PAD = round_up(act_dim, 8) columns;
    padded columns get zero weights and a NEG_BIG bias so softmax assigns
    them ~0 probability."""
    hidden, act_dim = w2.shape
    act_pad = _round_up(act_dim, 8)
    w2p = jnp.zeros((hidden, act_pad), jnp.float32).at[:, :act_dim].set(w2)
    b2p = jnp.full((1, act_pad), NEG_BIG, jnp.float32).at[:, :act_dim].set(
        b2.reshape(1, act_dim))
    return w2p, b2p


def policy_network_forward(x, w1, b1, w2p, b2p, act_dim, *, block_rows=2048):
    """x: (B, obs_dim) f32 -> (B, act_dim) action probabilities.

    w1: (obs_dim, 128), b1: (1, 128)
    w2p/b2p: pre-padded action head from pad_action_head() (done once at
    init, NOT per forward call).
    """
    batch, obs_dim = x.shape
    hidden = w1.shape[1]
    act_pad = w2p.shape[1]

    # Batch tile: multiple of 8 sublanes, no larger than needed for one pass.
    block = min(_round_up(block_rows, 8), _round_up(batch, 8))
    grid = (pl.cdiv(batch, block),)  # ragged last block: stores are masked

    # Double-buffered x + out blocks dominate VMEM (rows are lane-padded to
    # 128): ~ 2 arrays * 2 buffers * block * 128 * 4 B.  Only raise the
    # scoped-VMEM limit when a caller pushes block_rows past the defaults
    # (v5e's scoped default is 16 MiB; v7x has 64 MiB physical per TC).
    compiler_kwargs = dict(dimension_semantics=("parallel",))
    est_vmem = 2 * 2 * block * 128 * 4
    if est_vmem > (12 << 20):
        compiler_kwargs["vmem_limit_bytes"] = min(est_vmem + (8 << 20), 60 << 20)

    out = pl.pallas_call(
        policy_kernel,
        out_shape=jax.ShapeDtypeStruct((batch, act_pad), jnp.float32),
        grid=grid,
        in_specs=[
            # activations stream over the batch grid
            pl.BlockSpec((block, obs_dim), lambda i: (i, 0)),
            # weights/biases stay VMEM-resident (same block every grid step)
            pl.BlockSpec((obs_dim, hidden), lambda i: (0, 0)),
            pl.BlockSpec((1, hidden), lambda i: (0, 0)),
            pl.BlockSpec((hidden, act_pad), lambda i: (0, 0)),
            pl.BlockSpec((1, act_pad), lambda i: (0, 0)),
        ],
        out_specs=pl.BlockSpec((block, act_pad), lambda i: (i, 0)),
        compiler_params=pltpu.CompilerParams(**compiler_kwargs),
    )(x, w1, b1, w2p, b2p)

    # Tiny slice (reads act_pad = 8 lanes/row, not a 128-wide buffer).
    return out[:, :act_dim]


def init_params(key, obs_dim, act_dim, hidden=HIDDEN):
    """Deterministic init mimicking PyTorch Linear's U(-1/sqrt(fan_in), +)."""
    k1, k2, k3, k4 = jax.random.split(key, 4)
    s1 = 1.0 / jnp.sqrt(obs_dim)
    s2 = 1.0 / jnp.sqrt(hidden)
    # Stored already transposed to (in, out) for the kernel.
    w1 = jax.random.uniform(k1, (obs_dim, hidden), jnp.float32, -s1, s1)
    b1 = jax.random.uniform(k2, (1, hidden), jnp.float32, -s1, s1)
    w2 = jax.random.uniform(k3, (hidden, act_dim), jnp.float32, -s2, s2)
    b2 = jax.random.uniform(k4, (1, act_dim), jnp.float32, -s2, s2)
    return w1, b1, w2, b2


def _reference(x, w1, b1, w2, b2):
    h = jnp.maximum(x @ w1 + b1, 0.0)
    return jax.nn.softmax(h @ w2 + b2, axis=-1)


if __name__ == "__main__":
    key = jax.random.PRNGKey(0)
    obs_dim, act_dim = 4, 2  # CartPole-v1: 4 observations, 2 actions
    kx, kx2, kp = jax.random.split(key, 3)
    w1, b1, w2, b2 = init_params(kp, obs_dim, act_dim)
    # Action-head padding done ONCE at init (not on the forward path).
    w2p, b2p = pad_action_head(w2, b2)

    # --- small batch (single grid step) -------------------------------------
    batch = 8
    x = jax.random.normal(kx, (batch, obs_dim), jnp.float32)
    probs = jax.block_until_ready(
        policy_network_forward(x, w1, b1, w2p, b2p, act_dim))
    assert probs.shape == (batch, act_dim)
    assert bool(jnp.all(probs >= 0.0))
    assert bool(jnp.allclose(jnp.sum(probs, axis=-1), 1.0, atol=1e-5))
    assert bool(jnp.allclose(probs, _reference(x, w1, b1, w2, b2), atol=1e-5))

    # --- larger batch: multi-step batch grid + ragged (masked) last block ----
    batch2 = 60  # not a multiple of the 16-row tile -> ragged last block
    x2 = jax.random.normal(kx2, (batch2, obs_dim), jnp.float32)
    probs2 = jax.block_until_ready(
        policy_network_forward(x2, w1, b1, w2p, b2p, act_dim, block_rows=16))
    assert probs2.shape == (batch2, act_dim)
    assert bool(jnp.allclose(jnp.sum(probs2, axis=-1), 1.0, atol=1e-5))
    assert bool(jnp.allclose(probs2, _reference(x2, w1, b1, w2, b2), atol=1e-5))

    print("KERNEL_OK")
</pallas_src>

<mosaic_0001>
module attributes {stable_mosaic.version = 11 : i64} {
  func.func @policy_kernel(%arg0: i32, %arg1: memref<8x4xf32, #tpu.memory_space<vmem>>, %arg2: memref<4x128xf32, #tpu.memory_space<vmem>>, %arg3: memref<1x128xf32, #tpu.memory_space<vmem>>, %arg4: memref<128x8xf32, #tpu.memory_space<vmem>>, %arg5: memref<1x8xf32, #tpu.memory_space<vmem>>, %arg6: memref<8x8xf32, #tpu.memory_space<vmem>>) attributes {dimension_semantics = [#tpu.dimension_semantics<parallel>], iteration_bounds = array<i64: 1>, scalar_prefetch = 0 : i64, scratch_operands = 0 : i64, tpu.core_type = #tpu.core_type<tc>, window_params = [{transform_indices = @transform_0, window_bounds = array<i64: 8, 4>}, {pipeline_mode = #tpu.pipeline_mode<synchronous>, transform_indices = @transform_1, window_bounds = array<i64: 4, 128>}, {pipeline_mode = #tpu.pipeline_mode<synchronous>, transform_indices = @transform_2, window_bounds = array<i64: 1, 128>}, {pipeline_mode = #tpu.pipeline_mode<synchronous>, transform_indices = @transform_3, window_bounds = array<i64: 128, 8>}, {pipeline_mode = #tpu.pipeline_mode<synchronous>, transform_indices = @transform_4, window_bounds = array<i64: 1, 8>}, {transform_indices = @transform_5, window_bounds = array<i64: 8, 8>}]} {
    %c0 = arith.constant 0 : index
    %c0_0 = arith.constant 0 : index
    %0 = vector.load %arg1[%c0, %c0_0] : memref<8x4xf32, #tpu.memory_space<vmem>>, vector<8x4xf32>
    %c0_1 = arith.constant 0 : index
    %c0_2 = arith.constant 0 : index
    %1 = vector.load %arg2[%c0_1, %c0_2] : memref<4x128xf32, #tpu.memory_space<vmem>>, vector<4x128xf32>
    %cst = arith.constant dense<0.000000e+00> : vector<8x128xf32>
    %2 = tpu.matmul %0, %1, %cst {dimension_numbers = #tpu.dot_dimension_numbers<[1], [0], [0], [1], [0, 0, 1, 1], [], []>} : vector<8x4xf32>, vector<4x128xf32>, vector<8x128xf32> -> vector<8x128xf32>
    %c0_3 = arith.constant 0 : index
    %c0_4 = arith.constant 0 : index
    %3 = vector.load %arg3[%c0_3, %c0_4] : memref<1x128xf32, #tpu.memory_space<vmem>>, vector<1x128xf32>
    %4 = vector.broadcast %3 : vector<1x128xf32> to vector<8x128xf32>
    %5 = arith.addf %2, %4 : vector<8x128xf32>
    %cst_5 = arith.constant 0.000000e+00 : f32
    %6 = vector.broadcast %cst_5 : f32 to vector<8x128xf32>
    %7 = arith.maximumf %5, %6 : vector<8x128xf32>
    %c0_6 = arith.constant 0 : index
    %c0_7 = arith.constant 0 : index
    %8 = vector.load %arg4[%c0_6, %c0_7] : memref<128x8xf32, #tpu.memory_space<vmem>>, vector<128x8xf32>
    %cst_8 = arith.constant dense<0.000000e+00> : vector<8x8xf32>
    %9 = tpu.matmul %7, %8, %cst_8 {dimension_numbers = #tpu.dot_dimension_numbers<[1], [0], [0], [1], [0, 0, 1, 1], [], []>} : vector<8x128xf32>, vector<128x8xf32>, vector<8x8xf32> -> vector<8x8xf32>
    %c0_9 = arith.constant 0 : index
    %c0_10 = arith.constant 0 : index
    %10 = vector.load %arg5[%c0_9, %c0_10] : memref<1x8xf32, #tpu.memory_space<vmem>>, vector<1x8xf32>
    %11 = vector.broadcast %10 : vector<1x8xf32> to vector<8x8xf32>
    %12 = arith.addf %9, %11 : vector<8x8xf32>
    %cst_11 = arith.constant dense<0xFF800000> : vector<8xf32>
    %13 = vector.multi_reduction <maximumf>, %12, %cst_11 [1] : vector<8x8xf32> to vector<8xf32>
    %14 = vector.shape_cast %13 : vector<8xf32> to vector<8x1xf32>
    %15 = vector.broadcast %14 : vector<8x1xf32> to vector<8x8xf32>
    %16 = arith.subf %12, %15 : vector<8x8xf32>
    %17 = math.exp %16 : vector<8x8xf32>
    %cst_12 = arith.constant dense<0.000000e+00> : vector<8xf32>
    %18 = vector.multi_reduction <add>, %17, %cst_12 [1] : vector<8x8xf32> to vector<8xf32>
    %19 = vector.shape_cast %18 : vector<8xf32> to vector<8x1xf32>
    %20 = tpu.reciprocal %19 : vector<8x1xf32> -> vector<8x1xf32>
    %21 = vector.broadcast %20 : vector<8x1xf32> to vector<8x8xf32>
    %22 = arith.mulf %17, %21 : vector<8x8xf32>
    %c0_13 = arith.constant 0 : index
    %c0_14 = arith.constant 0 : index
    %23 = vector.load %arg6[%c0_13, %c0_14] : memref<8x8xf32, #tpu.memory_space<vmem>>, vector<8x8xf32>
    tpu.vector_store %arg6[%c0_13, %c0_14], %22 {strides = array<i32>} : memref<8x8xf32, #tpu.memory_space<vmem>>, vector<8x8xf32>,
    return
  }
  func.func @transform_0(%arg0: i32) -> (i32, i32) {
    %c0_i32 = arith.constant 0 : i32
    %c0_i32_0 = arith.constant 0 : i32
    return %arg0, %c0_i32 : i32, i32
  }
  func.func @transform_1(%arg0: i32) -> (i32, i32) {
    %c0_i32 = arith.constant 0 : i32
    %c0_i32_0 = arith.constant 0 : i32
    %c0_i32_1 = arith.constant 0 : i32
    return %c0_i32, %c0_i32_0 : i32, i32
  }
  func.func @transform_2(%arg0: i32) -> (i32, i32) {
    %c0_i32 = arith.constant 0 : i32
    %c0_i32_0 = arith.constant 0 : i32
    %c0_i32_1 = arith.constant 0 : i32
    return %c0_i32, %c0_i32_0 : i32, i32
  }
  func.func @transform_3(%arg0: i32) -> (i32, i32) {
    %c0_i32 = arith.constant 0 : i32
    %c0_i32_0 = arith.constant 0 : i32
    %c0_i32_1 = arith.constant 0 : i32
    return %c0_i32, %c0_i32_0 : i32, i32
  }
  func.func @transform_4(%arg0: i32) -> (i32, i32) {
    %c0_i32 = arith.constant 0 : i32
    %c0_i32_0 = arith.constant 0 : i32
    %c0_i32_1 = arith.constant 0 : i32
    return %c0_i32, %c0_i32_0 : i32, i32
  }
  func.func @transform_5(%arg0: i32) -> (i32, i32) {
    %c0_i32 = arith.constant 0 : i32
    %c0_i32_0 = arith.constant 0 : i32
    return %arg0, %c0_i32 : i32, i32
  }
}

</mosaic_0001>

<bundles_post_ra>
// kernel: tpu_custom_call.1
= control target key start
LH: loop header
LB: loop body
LE: loop exit
PB: predicated region body
PF: predicated region fallthrough
CT: control target
= control target key end

     0   :  { %vm34_vm0 = vcmask 1043456   ;;  %v321_v2 = vmov 0.0   ;;  %vm322_vm1 = vmmov 0   ;;  %vm30_vm2 = vcmask 31744   ;;  %s420_s0 = inlined_call_operand.vmem [shape: f32[8,4], index: 0, kind: input, shape index: {}]   ;;  %s421_s1 = inlined_call_operand.vmem [shape: f32[4,128], index: 1, kind: input, shape index: {}]   ;;  %s422_s2 = inlined_call_operand.vmem [shape: f32[1,128], index: 2, kind: input, shape index: {}]   ;;  %s423_s3 = inlined_call_operand.vmem [shape: f32[128,8], index: 3, kind: input, shape index: {}]   ;;  %s424_s4 = inlined_call_operand.vmem [shape: f32[1,8], index: 4, kind: input, shape index: {}]   ;;  %s425_s5 = inlined_call_operand.hbm [shape: f32[8,8], index: 5, kind: output, shape index: {}]  }
   0x1   :  { %v22_v0 = vld [vmem:[%s421_s1] sm:$0xf]  ;;  %252 = vmatprep.subr.mxu0 %v321_v2  ;;  %254 = vmatprep.mubr.msk.f32.mxu0 %vm322_vm1, %v321_v2  ;;  %v124_v3 = vld [vmem:[%s423_s3 + $0x78] sm:$0xff]  ;;  %v123_v4 = vld [vmem:[%s423_s3 + $0x70] sm:$0xff] }
   0x2   :  { %v21_v1 = vld [vmem:[%s420_s0] sm:$0xff]  ;;  %253 = vmatpush3.msk.msra.mxu0 %vm34_vm0, %v22_v0  ;;  %257 = vmatprep.subr.mxu1 %v321_v2  ;;  %v122_v5 = vld [vmem:[%s423_s3 + $0x68] sm:$0xff] }
   0x3   :  { %255 = vmatmul.mubr.msk.f32.vlgmr.msra.gmra.mxu0 %vm30_vm2, %v21_v1  ;;  %258 = vmatpush3.msra.mxu1 %v124_v3 }
   0x4   :  { %259 = vmatprep.subr.mxu1 %v321_v2  ;;  %289 = vmatprep.mubr.msk.f32.mxu1 %vm322_vm1, %v321_v2 }
   0x5   :  { %260 = vmatpush3.msra.mxu1 %v123_v4 }
   0x6   :  { %10 = vsyncpa [#allocation3], 0  ;;  %261 = vmatprep.subr.mxu1 %v321_v2  ;;  %v121_v6 = vld [vmem:[%s423_s3 + $0x60] sm:$0xff]  ;;  %v120_v7 = vld [vmem:[%s423_s3 + $0x58] sm:$0xff]  ;;  %vm202_vm3 = vcmask 64512  }
   0x7   :  { %262 = vmatpush3.msra.mxu1 %v122_v5  ;;  %v119_v8 = vld [vmem:[%s423_s3 + $0x50] sm:$0xff]  ;;  %v118_v9 = vld [vmem:[%s423_s3 + $0x48] sm:$0xff]  ;;  %v117_v10 = vld [vmem:[%s423_s3 + $0x40] sm:$0xff] }
   0x8   :  { %263 = vmatprep.subr.mxu1 %v321_v2  ;;  %v116_v11 = vld [vmem:[%s423_s3 + $0x38] sm:$0xff]  ;;  %v115_v12 = vld [vmem:[%s423_s3 + $0x30] sm:$0xff]  ;;  %v114_v13 = vld [vmem:[%s423_s3 + $0x28] sm:$0xff] }
   0x9   :  { %264 = vmatpush3.msra.mxu1 %v121_v6  ;;  %v113_v14 = vld [vmem:[%s423_s3 + $0x20] sm:$0xff]  ;;  %v112_v15 = vld [vmem:[%s423_s3 + $0x18] sm:$0xff]  ;;  %v111_v16 = vld [vmem:[%s423_s3 + $0x10] sm:$0xff] }
   0xa   :  { %265 = vmatprep.subr.mxu1 %v321_v2  ;;  %v110_v17 = vld [vmem:[%s423_s3 + $0x8] sm:$0xff]  ;;  %v109_v18 = vld [vmem:[%s423_s3] sm:$0xff] }
   0xb   :  { %266 = vmatpush3.msra.mxu1 %v120_v7  ;;  %v229_v19 = vld [vmem:[%s422_s2] ss:$0 sm:$0xff]  ;;  %s323_s2 = smov [#allocation2]  }
   0xc   :  { %267 = vmatprep.subr.mxu1 %v321_v2  ;;  %v232_v24 = vld [vmem:[%s424_s4] ss:$0 sm:$0xff]  ;;  %s221_s3 = sshll.u32 %s323_s2, 4  ;;  %s222_s3 = int_to_ptr.vmem [resolvable:$true] %s221_s3 }
   0xd   :  { %268 = vmatpush3.msra.mxu1 %v119_v8  ;;  %s299_s4 = scalar_lea.vmem %s222_s3, 128  ;;  %p304_p1 = scmp.lt.s32.totalorder %s222_s3, %s222_s3 }
   0xe   :  { %269 = vmatprep.subr.mxu1 %v321_v2  ;;  %p300_p0 = scmp.ne.s32.totalorder %s222_s3, %s299_s4  ;;  %p305_p2 = scmp.lt.s32.totalorder %s299_s4, %s299_s4 }
   0xf   :  { %270 = vmatpush3.msra.mxu1 %v118_v9 }
  0x10   :  { %271 = vmatprep.subr.mxu1 %v321_v2  ;;  %p306_p3 = por %p305_p2, %p304_p1 }
  0x11   :  { %272 = vmatpush3.msra.mxu1 %v117_v10 }
  0x12   :  { %273 = vmatprep.subr.mxu1 %v321_v2  ;;  %p307_p4 = pnand %p306_p3, %p300_p0 }
  0x13   :  { %274 = vmatpush3.msra.mxu1 %v116_v11 }
  0x14   :  { %275 = vmatprep.subr.mxu1 %v321_v2 }
  0x15   :  { %276 = vmatpush3.msra.mxu1 %v115_v12 }
  0x16   :  { %277 = vmatprep.subr.mxu1 %v321_v2 }
  0x17   :  { %278 = vmatpush3.msra.mxu1 %v114_v13 }
  0x18   :  { %279 = vmatprep.subr.mxu1 %v321_v2 }
  0x19   :  { %280 = vmatpush3.msra.mxu1 %v113_v14 }
  0x1a   :  { %281 = vmatprep.subr.mxu1 %v321_v2 }
  0x1b   :  { %282 = vmatpush3.msra.mxu1 %v112_v15 }
  0x1c   :  { %283 = vmatprep.subr.mxu1 %v321_v2 }
  0x1d   :  { %284 = vmatpush3.msra.mxu1 %v111_v16 }
  0x1e   :  { %285 = vmatprep.subr.mxu1 %v321_v2 }
  0x1f   :  { %286 = vmatpush3.msra.mxu1 %v110_v17 }
  0x20   :  { %287 = vmatprep.subr.mxu1 %v321_v2 }
  0x21   :  { %288 = vmatpush3.msra.mxu1 %v109_v18 }
  0xc3   :  { %v104_v20 = vpop.f32.mrf.mxu0 }
  0xc4   :  { %v105_v21 = vadd.f32 %v229_v19, %v104_v20 }
  0xc5   :  { %v256_v22 = vpop.f32.mrf.mxu0 }
  0xc6   :  { %v108_v23 = vmax.f32 %v105_v21, 0.0 }
  0xc8   :  { %290 = vmatmul.mubr.f32.vlgmr.msra.gmra.mxu1 %v108_v23 }
 0x188   :  { %v198_v25 = vpop.f32.mrf.mxu1 }
 0x189   :  { %v199_v26 = vadd.f32 %v232_v24, %v198_v25 }
 0x18a   :  { %v291_v27 = vpop.f32.mrf.mxu1 }
 0x18b   :  { %v203_v28 = vsel %vm202_vm3, %v199_v26, -inf }
 0x18c   :  { %204 = vmax.xlane.f32.xlu0 %v203_v28 }
 0x215   :  { %v205_v29 = vpop.xlane.xlu0 %204 }
 0x216   :  { %v206_v30 = vsub.f32 %v199_v26, %v205_v29 }
 0x218   :  { %v207_v31 = vmul.f32 1.442695, %v206_v30 }
 0x21a   :  { %295 = vpow2.f32 %v207_v31 }
 0x227   :  { %v296_v32 = vpop.eup %295 }
 0x228   :  { %v209_v33 = vsel %vm202_vm3, %v296_v32, 0.0 }
 0x229   :  { %210 = vadd.xlane.f32.xlu0 %v209_v33 }
 0x2b2   :  { %v211_v34 = vpop.xlane.xlu0 %210 }
 0x2b3   :  { %297 = vrcp.f32 %v211_v34 }
 0x2c0   :  { %v298_v35 = vpop.eup %297 }
 0x2c1   :  { %v213_v36 = vmul.f32 %v298_v35, %v296_v32 }
 0x2c3   :  { %214 = vst.msk [vmem:[#allocation2] sm:$0xff] %vm202_vm3, %v213_v36 }
 0x2c4   :  { %310 = shalt.err (!%p307_p4)
}
 0x2c5   :  { %224 = dma.vmem_to_hbm [thread:$0]  %s222_s3, 128, %s425_s5, [#allocation3]  }
 0x2c6   :  { %319 = dma.done.wait [#allocation3], 128  }
 0x2c7   :  { %320 = vsyncadd [#allocation3], 4294967168 }
 0x2c8   :  { %228 = vsyncpa [#allocation3], 1 }

</bundles_post_ra>
